<compile_context>
chip_gen: v7x
topology: tpu7x:2x2x1
jax: 0.10.0
libtpu: 0.0.40
codegen_flags: <defaults>
</compile_context>

<pallas_src>
import functools
import math

import jax
import jax.numpy as jnp
from jax import lax
from jax.experimental import pallas as pl
from jax.experimental.pallas import tpu as pltpu


_LANE = 128                        # TPU lane width
_SUB = 8                           # f32 sublane tiling
_FLAT_LANE = 512                   # lane width of the fully-flattened l1/l2 path
_TARGET_BLOCK_ELEMS = 128 * 1024   # ~512 KiB f32 per input block; with est+gt
                                   # double-buffered this stays ~2-3 MiB VMEM,
                                   # safe on v5e (16 MiB scoped default) and
                                   # v7x (64 MiB physical).


def _cdiv(a, b):
    return -(-a // b)


def _round_up(x, m):
    return _cdiv(x, m) * m


def _block_rows(rows, lane):
    """Pick (block_rows, padded_rows): largest block <= target that tiles rows."""
    target = max(_SUB, (_TARGET_BLOCK_ELEMS // max(lane, 1)) // _SUB * _SUB)
    rows8 = _round_up(max(rows, 1), _SUB)
    if rows8 <= target:
        return rows8, rows8
    nblk = _cdiv(rows8, target)
    br = _round_up(_cdiv(rows8, nblk), _SUB)
    return br, br * nblk


def _partial_out_block(num, den):
    """Scatter two scalars into a lane-dense (8, 128) block (unmasked store)."""
    row = lax.broadcasted_iota(jnp.int32, (_SUB, _LANE), 0)
    col = lax.broadcasted_iota(jnp.int32, (_SUB, _LANE), 1)
    blk = jnp.where((row == 0) & (col == 0), num, jnp.float32(0.0))
    blk = jnp.where((row == 0) & (col == 1), den, blk)
    return blk


# ----------------------------------------------------------------------------
# BaseLoss / GMoF: loss(est, gt=None, conf=None)
# ----------------------------------------------------------------------------
def _base_loss_kernel(*refs, has_gt, has_conf, needs_rows, norm, rho2, scale):
    i = 0
    e = refs[i][...].astype(jnp.float32)                  # cast on load
    i += 1
    if has_gt:
        e = e - refs[i][...].astype(jnp.float32)
        i += 1
    pe = jnp.abs(e) if norm == "l1" else e * e            # lane-dense VALU

    den = jnp.float32(0.0)
    if needs_rows:
        c = None
        if has_conf:
            c = refs[i][...].astype(jnp.float32)          # [br, group]
            i += 1
        ones_bd = refs[i][...]                            # [group*D, group]
        i += 1
        # Per-original-row sum over D on the MXU (keeps elementwise work
        # lane-dense; no [R, 1] keepdims intermediates).
        row = jnp.dot(pe, ones_bd, preferred_element_type=jnp.float32,
                      precision=lax.Precision.HIGHEST)    # [br, group]
        if norm == "gm":
            row = row / (row + jnp.float32(rho2))         # GMoF
        if has_conf:
            num = jnp.sum(row * c)
            den = jnp.sum(c)
        else:
            num = jnp.sum(row)
    else:
        num = jnp.sum(pe)                                 # single full reduce

    refs[-1][0] = _partial_out_block(num * jnp.float32(scale), den)


def _base_loss_call(est, gt, conf, *, norm, reduce, rho2):
    shape = est.shape
    D = int(shape[-1])
    R = 1
    for s in shape[:-1]:
        R *= int(s)
    has_gt = gt is not None
    has_conf = conf is not None
    needs_rows = has_conf or norm == "gm"   # per-original-row (dim=-1) sums needed

    ops = []
    in_specs = []
    if needs_rows:
        # Pack `group` original rows of width D into one lane-dense kernel row
        # of width group*D (always a multiple of 128).
        group = _LANE // math.gcd(D, _LANE)
        F = group * D
        rows = _cdiv(R, group)
        br, rows_pad = _block_rows(rows, F)
        R_pad = rows_pad * group

        def prep(x, width):
            x2 = x.reshape(R, width)
            if R_pad != R:                                # zero rows contribute 0
                x2 = jnp.pad(x2, ((0, R_pad - R), (0, 0)))
            return x2.reshape(rows_pad, group * width)

        ops.append(prep(est, D))
        in_specs.append(pl.BlockSpec((br, F), lambda i: (i, 0)))
        if has_gt:
            ops.append(prep(gt, D))
            in_specs.append(pl.BlockSpec((br, F), lambda i: (i, 0)))
        if has_conf:
            ops.append(prep(conf, 1))
            in_specs.append(pl.BlockSpec((br, group), lambda i: (i, 0)))
        # Block-diagonal ones [F, group]: column j sums lanes j*D .. (j+1)*D-1.
        ones_bd = (jnp.arange(F, dtype=jnp.int32)[:, None] // D
                   == jnp.arange(group, dtype=jnp.int32)[None, :]).astype(jnp.float32)
        ops.append(ones_bd)
        # Constant block index -> DMA'd once, reused every grid step.
        in_specs.append(pl.BlockSpec((F, group), lambda i: (0, 0)))
    else:
        # Pure full-sum (l1/l2, no conf): flatten completely to a lane-dense slab.
        N = R * D
        rows = _cdiv(N, _FLAT_LANE)
        br, rows_pad = _block_rows(rows, _FLAT_LANE)
        N_pad = rows_pad * _FLAT_LANE

        def prep(x):
            x1 = x.reshape(N)
            if N_pad != N:                                # zero pad: |0| = 0^2 = 0
                x1 = jnp.pad(x1, (0, N_pad - N))
            return x1.reshape(rows_pad, _FLAT_LANE)

        ops.append(prep(est))
        in_specs.append(pl.BlockSpec((br, _FLAT_LANE), lambda i: (i, 0)))
        if has_gt:
            ops.append(prep(gt))
            in_specs.append(pl.BlockSpec((br, _FLAT_LANE), lambda i: (i, 0)))

    # Static final scale folded into each block's partial numerator.
    if has_conf:
        scale = 1.0 if (norm == "gm" or reduce == "sum") else 1.0 / D
    elif norm == "gm":
        scale = 1.0 / R
    else:
        scale = (1.0 / R) if reduce == "sum" else 1.0 / (R * D)

    nb = rows_pad // br
    kernel = functools.partial(
        _base_loss_kernel, has_gt=has_gt, has_conf=has_conf,
        needs_rows=needs_rows, norm=norm, rho2=rho2, scale=scale)

    partials = pl.pallas_call(
        kernel,
        out_shape=jax.ShapeDtypeStruct((nb, _SUB, _LANE), jnp.float32),
        grid=(nb,),
        in_specs=in_specs,
        out_specs=pl.BlockSpec((1, _SUB, _LANE), lambda i: (i, 0, 0)),
        compiler_params=pltpu.CompilerParams(
            dimension_semantics=("parallel",)),   # megacore-shardable on v7x
    )(*ops)

    num = jnp.sum(partials[:, 0, 0])
    if has_conf:
        den = jnp.sum(partials[:, 0, 1])
        return num / (jnp.float32(1e-5) + den)
    return num


class BaseLossPallas:
    """JAX/Pallas port of BaseLoss.make_loss (norm in {'l2','l1','gm'})."""

    def __init__(self, norm="l2", norm_info=1.0, reduce="sum"):
        assert norm in ("l2", "l1", "gm")
        self.norm = norm
        self.reduce = reduce
        self.rho2 = float(norm_info) * float(norm_info)   # GMoF rho^2

    def __call__(self, est, gt=None, conf=None):
        return _base_loss_call(est, gt, conf, norm=self.norm,
                               reduce=self.reduce, rho2=self.rho2)

    # BaseLoss.forward(pred, target) in the spec is `pass`; subclasses use
    # self.loss (== __call__ here).


# ----------------------------------------------------------------------------
# AnySmooth: temporal smoothness built on the BaseLoss norms (conf=None path)
# ----------------------------------------------------------------------------
def _smooth_kernel(v_ref, out_ref, *, specs, order, norm, rho2, j, d):
    """v_ref: [T, J*D] lane-dense.  specs: ((width, weight/numel), ...)."""
    v = v_ref[...].astype(jnp.float32)
    if norm == "gm":
        f = j * d
        ones_bd = (lax.broadcasted_iota(jnp.int32, (f, j), 0) // d
                   == lax.broadcasted_iota(jnp.int32, (f, j), 1)).astype(jnp.float32)
    total = jnp.float32(0.0)
    for width, scale in specs:                            # static unroll over widths
        vel = v[width:] - v[:-width]
        if order == 2:
            vel = vel[1:] - vel[:-1]
        if norm == "l2":
            part = jnp.sum(vel * vel)
        elif norm == "l1":
            part = jnp.sum(jnp.abs(vel))
        else:  # gm: per-(t, joint) sum over D on the MXU, then GMoF
            sq = jnp.dot(vel * vel, ones_bd, preferred_element_type=jnp.float32,
                         precision=lax.Precision.HIGHEST)   # [T', J]
            part = jnp.sum(sq / (sq + jnp.float32(rho2)))
        total = total + jnp.float32(scale) * part         # scalar partial per width
    out_ref[0, 0] = total


class AnySmoothPallas:
    """Temporal smoothness: sum_w weight_w * BaseLoss_norm(value[w:] - value[:-w])."""

    def __init__(self, key, weight, norm, norm_info=1.0, dim=-1, order=1):
        assert norm in ("l2", "l1", "gm")
        self.key = key
        self.weight = tuple(float(w) for w in weight)
        self.norm = norm
        self.rho2 = float(norm_info) * float(norm_info)
        self.order = int(order)
        self.dim = dim  # norm reduces dim=-1, matching the reference

    def __call__(self, pred, target=None):
        value = pred[self.key]
        T = int(value.shape[0])
        zero = jnp.zeros((), jnp.float32)
        if T <= len(self.weight):                         # module's early exit
            return zero

        J = 1
        for s in value.shape[1:-1]:
            J *= int(s)
        D = int(value.shape[-1])

        # Fold weight / numel per width at trace time; skip empty terms so the
        # order==2 edge case cannot produce 0/0 = NaN.
        specs = []
        for width, weight in enumerate(self.weight, start=1):
            n = T - width - (self.order - 1)
            if n <= 0:
                continue
            specs.append((width, weight / float(n * J)))
        if not specs:
            return zero
        specs = tuple(specs)

        vflat = value.reshape(T, J * D)                   # lane-dense, original dtype
        kernel = functools.partial(_smooth_kernel, specs=specs, order=self.order,
                                   norm=self.norm, rho2=self.rho2, j=J, d=D)
        out = pl.pallas_call(
            kernel,
            out_shape=jax.ShapeDtypeStruct((1, 1), jnp.float32),
            in_specs=[pl.BlockSpec(memory_space=pltpu.MemorySpace.VMEM)],
            out_specs=pl.BlockSpec(memory_space=pltpu.MemorySpace.SMEM),
        )(vflat)
        return out[0, 0]


# ----------------------------------------------------------------------------
# Pure-JAX references (PyTorch semantics)
# ----------------------------------------------------------------------------
def _reference_smooth(value, weights, order, norm, rho2):
    value = value.astype(jnp.float32)
    loss = jnp.float32(0.0)
    for width, weight in enumerate(weights, start=1):
        vel = value[width:] - value[:-width]
        if order == 2:
            vel = vel[1:] - vel[:-1]
        if vel.shape[0] == 0:
            continue
        if norm == "l2":
            sd = jnp.sum(vel ** 2, axis=-1)
        elif norm == "l1":
            sd = jnp.sum(jnp.abs(vel), axis=-1)
        else:
            sq = jnp.sum(vel ** 2, axis=-1)
            sd = sq / (sq + rho2)
        loss = loss + weight * (jnp.sum(sd) / sd.size)
    return loss


def _reference_base(est, gt=None, conf=None, norm="l2", norm_info=1.0, reduce="sum"):
    est = est.astype(jnp.float32)
    d = est - gt.astype(jnp.float32) if gt is not None else est
    if norm == "gm":
        sq = jnp.sum(d * d, axis=-1)
        diff = sq / (sq + float(norm_info) ** 2)
    else:
        g = d * d if norm == "l2" else jnp.abs(d)
        diff = jnp.sum(g, axis=-1) if reduce == "sum" else jnp.mean(g, axis=-1)
    if conf is not None:
        c = conf.astype(jnp.float32)
        return jnp.sum(diff * c) / (1e-5 + jnp.sum(c))
    return jnp.sum(diff) / diff.size


# ----------------------------------------------------------------------------
if __name__ == "__main__":
    root = jax.random.PRNGKey(0)
    k_val, k_est, k_gt, k_conf, k_be, k_bg, k_bc, k_kp = jax.random.split(root, 8)

    checks = []

    # --- AnySmooth-style temporal smoothness (uses the BaseLoss norms) ---
    T, J, D = 16, 8, 32
    value = jax.random.normal(k_val, (T, J, D), dtype=jnp.float32)
    weights = (0.5, 0.3, 0.2)

    m_l2 = AnySmoothPallas(key="poses", weight=weights, norm="l2", order=1)
    checks.append(("smooth_l2",
                   jax.block_until_ready(m_l2({"poses": value})),
                   _reference_smooth(value, weights, 1, "l2", 1.0)))

    m_gm = AnySmoothPallas(key="poses", weight=weights, norm="gm",
                           norm_info=0.5, order=1)
    checks.append(("smooth_gm",
                   jax.block_until_ready(m_gm({"poses": value})),
                   _reference_smooth(value, weights, 1, "gm", 0.25)))

    m_l2o2 = AnySmoothPallas(key="poses", weight=weights, norm="l2", order=2)
    checks.append(("smooth_l2_order2",
                   jax.block_until_ready(m_l2o2({"poses": value})),
                   _reference_smooth(value, weights, 2, "l2", 1.0)))

    m_l1 = AnySmoothPallas(key="poses", weight=weights, norm="l1", order=1)
    v_bf16 = value.astype(jnp.bfloat16)
    checks.append(("smooth_l1_bf16",
                   jax.block_until_ready(m_l1({"poses": v_bf16})),
                   _reference_smooth(v_bf16, weights, 1, "l1", 1.0)))

    short = m_l2({"poses": value[: len(weights)]})
    assert short.shape == () and float(short) == 0.0

    checks.append(("smooth_l2_order2_degenerate",
                   jax.block_until_ready(m_l2o2({"poses": value[:4]})),
                   _reference_smooth(value[:4], weights[:2], 2, "l2", 1.0)))

    # --- BaseLoss / GMoF direct losses (small shapes) ---
    est = jax.random.normal(k_est, (8, 64, 32), dtype=jnp.float32)
    gt = jax.random.normal(k_gt, (8, 64, 32), dtype=jnp.float32)
    conf = jax.random.uniform(k_conf, (8, 64), dtype=jnp.float32)

    bl_l2 = BaseLossPallas(norm="l2", reduce="sum")
    checks.append(("base_l2_gt_conf",
                   jax.block_until_ready(bl_l2(est, gt, conf)),
                   _reference_base(est, gt, conf, norm="l2", reduce="sum")))
    checks.append(("base_l2_plain",
                   jax.block_until_ready(bl_l2(est)),
                   _reference_base(est, norm="l2", reduce="sum")))
    checks.append(("base_l2_conf_nogt",
                   jax.block_until_ready(bl_l2(est, conf=conf)),
                   _reference_base(est, conf=conf, norm="l2", reduce="sum")))

    bl_l1m = BaseLossPallas(norm="l1", reduce="mean")
    checks.append(("base_l1_mean_gt",
                   jax.block_until_ready(bl_l1m(est, gt)),
                   _reference_base(est, gt, norm="l1", reduce="mean")))
    checks.append(("base_l1_mean_gt_conf",
                   jax.block_until_ready(bl_l1m(est, gt, conf)),
                   _reference_base(est, gt, conf, norm="l1", reduce="mean")))

    bl_gm = BaseLossPallas(norm="gm", norm_info=0.3)
    checks.append(("base_gm_gt_conf",
                   jax.block_until_ready(bl_gm(est, gt, conf)),
                   _reference_base(est, gt, conf, norm="gm", norm_info=0.3)))
    checks.append(("base_gm_plain",
                   jax.block_until_ready(bl_gm(est)),
                   _reference_base(est, norm="gm", norm_info=0.3)))

    # --- keypoint-style odd shape (D=3, conf): exercises the group=128 path ---
    kpts = jax.random.normal(k_kp, (7, 13, 3), dtype=jnp.float32)
    kpts_gt = kpts + 0.1 * jax.random.normal(k_bc, (7, 13, 3), dtype=jnp.float32)
    kpts_conf = jax.random.uniform(k_conf, (7, 13), dtype=jnp.float32)
    checks.append(("base_l2_kpts_conf",
                   jax.block_until_ready(bl_l2(kpts, kpts_gt, kpts_conf)),
                   _reference_base(kpts, kpts_gt, kpts_conf, norm="l2", reduce="sum")))
    checks.append(("base_gm_kpts_conf",
                   jax.block_until_ready(bl_gm(kpts, kpts_gt, kpts_conf)),
                   _reference_base(kpts, kpts_gt, kpts_conf, norm="gm", norm_info=0.3)))

    # --- larger inputs: multi-block grid (nb > 1), pipelined + parallel ---
    est_b = jax.random.normal(k_be, (32, 512, 32), dtype=jnp.float32)
    gt_b = jax.random.normal(k_bg, (32, 512, 32), dtype=jnp.float32)
    conf_b = jax.random.uniform(k_bc, (32, 512), dtype=jnp.float32)

    checks.append(("base_l2_big_bf16",
                   jax.block_until_ready(
                       bl_l2(est_b.astype(jnp.bfloat16), gt_b.astype(jnp.bfloat16))),
                   _reference_base(est_b.astype(jnp.bfloat16),
                                   gt_b.astype(jnp.bfloat16),
                                   norm="l2", reduce="sum")))
    checks.append(("base_gm_big_conf",
                   jax.block_until_ready(bl_gm(est_b, gt_b, conf_b)),
                   _reference_base(est_b, gt_b, conf_b, norm="gm", norm_info=0.3)))

    for name, got, want in checks:
        assert got.shape == (), (name, got.shape)
        assert jnp.allclose(got, want, rtol=5e-4, atol=1e-5), \
            (name, float(got), float(want))

    print("KERNEL_OK")
</pallas_src>

<mosaic_0001>
module attributes {stable_mosaic.version = 11 : i64} {
  func.func @_smooth_kernel(%arg0: memref<16x256xf32, #tpu.memory_space<vmem>>, %arg1: memref<1x1xf32, #tpu.memory_space<smem>>) attributes {dimension_semantics = [], scalar_prefetch = 0 : i64, scratch_operands = 0 : i64, tpu.core_type = #tpu.core_type<tc>} {
    %c0 = arith.constant 0 : index
    %c0_0 = arith.constant 0 : index
    %0 = vector.load %arg0[%c0, %c0_0] : memref<16x256xf32, #tpu.memory_space<vmem>>, vector<16x256xf32>
    %1 = vector.extract_strided_slice %0 {offsets = [1, 0], sizes = [15, 256], strides = [1, 1]} : vector<16x256xf32> to vector<15x256xf32>
    %2 = vector.extract_strided_slice %0 {offsets = [0, 0], sizes = [15, 256], strides = [1, 1]} : vector<16x256xf32> to vector<15x256xf32>
    %3 = arith.subf %1, %2 : vector<15x256xf32>
    %4 = arith.mulf %3, %3 : vector<15x256xf32>
    %5 = vector.shape_cast %4 : vector<15x256xf32> to vector<1x15x256xf32>
    %cst = arith.constant dense<0.000000e+00> : vector<1xf32>
    %6 = vector.multi_reduction <add>, %5, %cst [1, 2] : vector<1x15x256xf32> to vector<1xf32>
    %7 = vector.shape_cast %6 : vector<1xf32> to vector<1x1x1xf32>
    %8 = vector.extract %7[0, 0, 0] : f32 from vector<1x1x1xf32>
    %cst_1 = arith.constant 0.00416666688 : f32
    %9 = arith.mulf %cst_1, %8 : f32
    %cst_2 = arith.constant 0.000000e+00 : f32
    %10 = arith.addf %cst_2, %9 : f32
    %11 = vector.extract_strided_slice %0 {offsets = [2, 0], sizes = [14, 256], strides = [1, 1]} : vector<16x256xf32> to vector<14x256xf32>
    %12 = vector.extract_strided_slice %0 {offsets = [0, 0], sizes = [14, 256], strides = [1, 1]} : vector<16x256xf32> to vector<14x256xf32>
    %13 = arith.subf %11, %12 : vector<14x256xf32>
    %14 = arith.mulf %13, %13 : vector<14x256xf32>
    %15 = vector.shape_cast %14 : vector<14x256xf32> to vector<1x14x256xf32>
    %cst_3 = arith.constant dense<0.000000e+00> : vector<1xf32>
    %16 = vector.multi_reduction <add>, %15, %cst_3 [1, 2] : vector<1x14x256xf32> to vector<1xf32>
    %17 = vector.shape_cast %16 : vector<1xf32> to vector<1x1x1xf32>
    %18 = vector.extract %17[0, 0, 0] : f32 from vector<1x1x1xf32>
    %cst_4 = arith.constant 0.0026785715 : f32
    %19 = arith.mulf %cst_4, %18 : f32
    %20 = arith.addf %10, %19 : f32
    %21 = vector.extract_strided_slice %0 {offsets = [3, 0], sizes = [13, 256], strides = [1, 1]} : vector<16x256xf32> to vector<13x256xf32>
    %22 = vector.extract_strided_slice %0 {offsets = [0, 0], sizes = [13, 256], strides = [1, 1]} : vector<16x256xf32> to vector<13x256xf32>
    %23 = arith.subf %21, %22 : vector<13x256xf32>
    %24 = arith.mulf %23, %23 : vector<13x256xf32>
    %25 = vector.shape_cast %24 : vector<13x256xf32> to vector<1x13x256xf32>
    %cst_5 = arith.constant dense<0.000000e+00> : vector<1xf32>
    %26 = vector.multi_reduction <add>, %25, %cst_5 [1, 2] : vector<1x13x256xf32> to vector<1xf32>
    %27 = vector.shape_cast %26 : vector<1xf32> to vector<1x1x1xf32>
    %28 = vector.extract %27[0, 0, 0] : f32 from vector<1x1x1xf32>
    %cst_6 = arith.constant 0.00192307692 : f32
    %29 = arith.mulf %cst_6, %28 : f32
    %30 = arith.addf %20, %29 : f32
    %c0_7 = arith.constant 0 : index
    %c0_8 = arith.constant 0 : index
    %31 = memref.load %arg1[%c0_7, %c0_8] : memref<1x1xf32, #tpu.memory_space<smem>>
    memref.store %30, %arg1[%c0_7, %c0_8] : memref<1x1xf32, #tpu.memory_space<smem>>
    return
  }
}

</mosaic_0001>

<bundles_post_ra>
// kernel: tpu_custom_call.1
= control target key start
LH: loop header
LB: loop body
LE: loop exit
PB: predicated region body
PF: predicated region fallthrough
CT: control target
= control target key end

     0   :  { %6 = vsyncpa [#allocation3], 0  ;;  %s295_s0 = inlined_call_operand.hbm [shape: f32[16,256], index: 0, kind: input, shape index: {}]   ;;  %s296_s1 = inlined_call_operand.hbm [shape: f32[1,1], index: 1, kind: output, shape index: {}]  }
   0x1   :  { %7 = vsyncpa [#allocation4], 0  ;;  %s243_s6 = smov [#allocation2]   ;;  %s207_s10 = scalar_lea.hbm %s295_s0, 512 }
   0x2   :  { %s13_s7 = sshll.u32 %s243_s6, 4  ;;  %p208_p0 = scmp.ne.s32.totalorder %s295_s0, %s207_s10  ;;  %s14_s7 = int_to_ptr.vmem [resolvable:$true] %s13_s7 }
   0x3   :  { %p211_p1 = scmp.lt.u32.totalorder %s207_s10, %s295_s0 }
   0x5   :  { %p213_p2 = pnand %p211_p1, %p208_p0 }
   0x7   :  { %216 = shalt.err (!%p213_p2)
}
   0x8   :  { %s217_s15 = scalar_lea.vmem %s14_s7, 512  ;;  %p222_p4 = scmp.lt.s32.totalorder %s14_s7, %s14_s7 }
   0x9   :  { %p218_p3 = scmp.ne.s32.totalorder %s14_s7, %s217_s15  ;;  %p223_p5 = scmp.lt.s32.totalorder %s217_s15, %s217_s15 }
   0xb   :  { %p224_p6 = por %p223_p5, %p222_p4 }
   0xd   :  { %p225_p7 = pnand %p224_p6, %p218_p3 }
   0xf   :  { %228 = shalt.err (!%p225_p7)
}
  0x10   :  { %s244_s16 = smov 256   ;;  %s245_s17 = smov 16  }
  0x11   :  { %19 = dma.hbm_to_vmem [thread:$0]  %s295_s0, 512, %s14_s7, [#allocation3], %s244_s16, %s244_s16, %s245_s17  }
  0x12   :  { %239 = dma.done.wait [#allocation3], 512  }
  0x13   :  { %240 = vsyncadd [#allocation3], 4294966784  ;;  %v23_v0 = vld [vmem:[#allocation2] sm:$0xff]  ;;  %v24_v1 = vld [vmem:[#allocation2 + $0x8] sm:$0xff]  ;;  %vm131_vm0 = vcmask 1042432   ;;  %vm154_vm1 = vcmask 1044480  }
  0x14   :  { %v25_v2 = vld [vmem:[#allocation2 + $0x10] sm:$0xff]  ;;  %vm31_vm2 = vcmask 1040384   ;;  %v26_v3 = vld [vmem:[#allocation2 + $0x18] sm:$0xff]  ;;  %v132_v4 = vrot.slane %v23_v0, 5  ;;  %v133_v5 = vrot.slane %v24_v1, 5  ;;  %v32_v7 = vrot.slane %v23_v0, 7 }
  0x15   :  { %v134_v6 = vrot.slane %v25_v2, 5  ;;  %vm54_vm3 = vcmask 1046528   ;;  %v136_v8 = vrot.slane %v26_v3, 5  ;;  %v33_v9 = vrot.slane %v24_v1, 7  ;;  %s229_s29 = scalar_lea.hbm %s296_s1, 16 }
  0x16   :  { %v34_v10 = vrot.slane %v25_v2, 7  ;;  %v36_v11 = vrot.slane %v26_v3, 7  ;;  %vm81_vm4 = vcmask 1041408   ;;  %v142_v13 = vsub.f32 %v23_v0, %v132_v4  ;;  %p230_p8 = scmp.ne.s32.totalorder %s296_s1, %s229_s29  ;;  %p233_p9 = scmp.lt.u32.totalorder %s229_s29, %s296_s1 }
  0x17   :  { %v135_v12 = vsel %vm131_vm0, %v132_v4, %v134_v6  ;;  %v143_v14 = vsub.f32 %v24_v1, %v133_v5  ;;  %v42_v15 = vsub.f32 %v23_v0, %v32_v7  ;;  %v137_v16 = vsel %vm131_vm0, %v133_v5, %v136_v8 }
  0x18   :  { %v144_v17 = vsub.f32 %v25_v2, %v135_v12  ;;  %v35_v18 = vsel %vm31_vm2, %v32_v7, %v34_v10  ;;  %v37_v19 = vsel %vm31_vm2, %v33_v9, %v36_v11  ;;  %v145_v20 = vsub.f32 %v26_v3, %v137_v16  ;;  %p235_p10 = pnand %p233_p9, %p230_p8 }
  0x19   :  { %v146_v21 = vmul.f32 %v142_v13, %v142_v13  ;;  %v147_v22 = vmul.f32 %v143_v14, %v143_v14  ;;  %v43_v23 = vsub.f32 %v24_v1, %v33_v9  ;;  %v44_v25 = vsub.f32 %v25_v2, %v35_v18 }
  0x1a   :  { %v148_v24 = vmul.f32 %v144_v17, %v144_v17  ;;  %v45_v26 = vsub.f32 %v26_v3, %v37_v19  ;;  %v46_v27 = vmul.f32 %v42_v15, %v42_v15  ;;  %v149_v28 = vmul.f32 %v145_v20, %v145_v20 }
  0x1b   :  { %v155_v29 = vrot.slane %v146_v21, 3  ;;  %v158_v30 = vrot.slane %v147_v22, 3  ;;  %v47_v31 = vmul.f32 %v43_v23, %v43_v23  ;;  %v48_v33 = vmul.f32 %v44_v25, %v44_v25 }
  0x1c   :  { %v156_v32 = vrot.slane %v148_v24, 3  ;;  %v49_v34 = vmul.f32 %v45_v26, %v45_v26  ;;  %v55_v35 = vrot.slane %v46_v27, 1  ;;  %v159_v36 = vrot.slane %v149_v28, 3 }
  0x1d   :  { %v58_v37 = vrot.slane %v47_v31, 1  ;;  %v82_v38 = vrot.slane %v23_v0, 6  ;;  %v83_v39 = vrot.slane %v24_v1, 6  ;;  %v56_v42 = vrot.slane %v48_v33, 1 }
  0x1e   :  { %v157_v40 = vsel %vm154_vm1, %v155_v29, %v156_v32  ;;  %v166_v41 = vsel %vm154_vm1, %v156_v32, 0.0  ;;  %v59_v43 = vrot.slane %v49_v34, 1  ;;  %v160_v44 = vsel %vm154_vm1, %v158_v30, %v159_v36 }
  0x1f   :  { %v168_v45 = vsel %vm154_vm1, %v159_v36, 0.0  ;;  %v84_v46 = vrot.slane %v25_v2, 6  ;;  %v86_v47 = vrot.slane %v26_v3, 6  ;;  %v165_v48 = vadd.f32 %v160_v44, %v157_v40 }
  0x20   :  { %v57_v49 = vsel %vm54_vm3, %v55_v35, %v56_v42  ;;  %v60_v50 = vsel %vm54_vm3, %v58_v37, %v59_v43  ;;  %v66_v51 = vsel %vm54_vm3, %v56_v42, 0.0  ;;  %v68_v53 = vsel %vm54_vm3, %v59_v43, 0.0 }
  0x21   :  { %v65_v52 = vadd.f32 %v60_v50, %v57_v49  ;;  %v85_v54 = vsel %vm81_vm4, %v82_v38, %v84_v46  ;;  %v87_v55 = vsel %vm81_vm4, %v83_v39, %v86_v47  ;;  %v167_v56 = vadd.f32 %v166_v41, %v165_v48 }
  0x22   :  { %v92_v57 = vsub.f32 %v23_v0, %v82_v38  ;;  %v93_v58 = vsub.f32 %v24_v1, %v83_v39  ;;  %v94_v59 = vsub.f32 %v25_v2, %v85_v54  ;;  %v95_v61 = vsub.f32 %v26_v3, %v87_v55 }
  0x23   :  { %v67_v60 = vadd.f32 %v66_v51, %v65_v52  ;;  %v169_v62 = vadd.f32 %v168_v45, %v167_v56  ;;  %vm104_vm5 = vcmask 1045504  }
  0x24   :  { %v96_v63 = vmul.f32 %v92_v57, %v92_v57  ;;  %v97_v4 = vmul.f32 %v93_v58, %v93_v58  ;;  %v98_v5 = vmul.f32 %v94_v59, %v94_v59  ;;  %v99_v7 = vmul.f32 %v95_v61, %v95_v61 }
  0x25   :  { %v69_v6 = vadd.f32 %v68_v53, %v67_v60  ;;  %170 = vadd.xlane.f32.xlu1 %v169_v62 }
  0x26   :  { %v105_v8 = vrot.slane %v96_v63, 2  ;;  %v106_v9 = vrot.slane %v98_v5, 2  ;;  %v108_v10 = vrot.slane %v97_v4, 2  ;;  %v109_v11 = vrot.slane %v99_v7, 2 }
  0x27   :  { %70 = vadd.xlane.f32.xlu0 %v69_v6 }
  0x28   :  { %v107_v12 = vsel %vm104_vm5, %v105_v8, %v106_v9  ;;  %v110_v13 = vsel %vm104_vm5, %v108_v10, %v109_v11  ;;  %v116_v0 = vsel %vm104_vm5, %v106_v9, 0.0  ;;  %v118_v2 = vsel %vm104_vm5, %v109_v11, 0.0 }
  0x29   :  { %v115_v1 = vadd.f32 %v110_v13, %v107_v12 }
  0x2b   :  { %v117_v14 = vadd.f32 %v116_v0, %v115_v1 }
  0x2d   :  { %v119_v3 = vadd.f32 %v118_v2, %v117_v14 }
  0x2f   :  { %120 = vadd.xlane.f32.xlu0 %v119_v3 }
  0xb2   :  { %v171_v15 = vpop.xlane.xlu1 %170 }
  0xb3   :  { %v172_v17 = vrot.slane %v171_v15, 4 }
  0xb4   :  { %v71_v16 = vpop.xlane.xlu0 %70 }
  0xb5   :  { %v72_v18 = vrot.slane %v71_v16, 4  ;;  %v173_v20 = vadd.f32 %v172_v17, %v171_v15 }
  0xb7   :  { %v73_v19 = vadd.f32 %v72_v18, %v71_v16  ;;  %v174_v23 = vrot.slane %v173_v20, 2 }
  0xb9   :  { %v74_v21 = vrot.slane %v73_v19, 2  ;;  %v175_v29 = vadd.f32 %v174_v23, %v173_v20 }
  0xbb   :  { %v75_v22 = vadd.f32 %v74_v21, %v73_v19  ;;  %v176_v32 = vrot.slane %v175_v29, 1 }
  0xbc   :  { %v121_v24 = vpop.xlane.xlu0 %120 }
  0xbd   :  { %v76_v25 = vrot.slane %v75_v22, 1  ;;  %v122_v26 = vrot.slane %v121_v24, 4  ;;  %v177_v35 = vadd.f32 %v176_v32, %v175_v29 }
  0xbf   :  { %v77_v27 = vadd.f32 %v76_v25, %v75_v22  ;;  %v123_v28 = vadd.f32 %v122_v26, %v121_v24 }
  0xc1   :  { %197 = vpush %v77_v27  ;;  %v124_v30 = vrot.slane %v123_v28, 2 }
  0xc3   :  { %v125_v31 = vadd.f32 %v124_v30, %v123_v28 }
  0xc5   :  { %v126_v33 = vrot.slane %v125_v31, 1 }
  0xc7   :  { %v127_v34 = vadd.f32 %v126_v33, %v125_v31 }
  0xc9   :  { %199 = vpush %v127_v34 }
  0xca   :  { %201 = vpush %v177_v35 }
  0xf2   :  { %s198_s0 = spop %197 }
  0xf3   :  { %s79_s20 = smul.f32 0.004166667, %s198_s0 }
  0xfa   :  { %s200_s21 = spop %199 }
  0xfb   :  { %s129_s22 = smul.f32 0.0026785715, %s200_s21  ;;  %s202_s23 = spop %201 }
  0xfc   :  { %s179_s25 = smul.f32 0.0019230769, %s202_s23 }
  0xfd   :  { %s130_s24 = sadd.f32 %s129_s22, %s79_s20 }
  0xff   :  { %s180_s26 = sadd.f32 %s179_s25, %s130_s24 }
 0x101   :  { %182 = sst [smem:[#allocation5]] %s180_s26 }
 0x102   :  { %238 = shalt.err (!%p235_p10)
}
 0x103   :  { %s246_s5 = smov [#allocation5]  }
 0x104   :  { %190 = dma.smem_to_hbm %s246_s5, 16, %s296_s1, [#allocation4]  }
 0x105   :  { %241 = dma.done.wait [#allocation4], 16  }
 0x106   :  { %242 = vsyncadd [#allocation4], 4294967280 }
 0x107   :  { %194 = sfence }
 0x108   :  { %195 = vsyncpa [#allocation3], 1 }
 0x109   :  { %196 = vsyncpa [#allocation4], 1 }

</bundles_post_ra>
